<compile_context>
chip_gen: v7x
topology: tpu7x:2x2x1
jax: 0.10.0
libtpu: 0.0.40
codegen_flags: <defaults>
</compile_context>

<pallas_src>
import math
from functools import partial

import jax
import jax.numpy as jnp
from jax import lax
from jax.experimental import pallas as pl
from jax.experimental.pallas import tpu as pltpu


def _plastic_mha_kernel(x_ref, w_ref, b_ref, o_ref, *, num_heads, q_tile):
    # x_ref: (1, S, E) bf16      current batch element
    # w_ref: (E, 3E)  bf16       fused qkv weight (scale / trace-diag folded in)
    # b_ref: (1, 3E)  f32        fused qkv bias   (scale / trace-diag folded in)
    # o_ref: (1, S, E)           output, already in (B, S, E) layout
    S = x_ref.shape[1]
    E = x_ref.shape[2]
    Dh = E // num_heads

    x = x_ref[0]                                                     # (S, E) bf16

    # Fused QKV projection: one lane-dense matmul, f32 accumulation.
    qkv = jnp.dot(x, w_ref[...], preferred_element_type=jnp.float32)  # (S, 3E) f32
    qkv = qkv + b_ref[...]                                            # bias in f32
    qkv_lo = qkv.astype(jnp.bfloat16)                                 # MXU operands

    # Per-head K / V slices (static lane slices, scale & trace already folded).
    k_heads = [qkv_lo[:, E + h * Dh:E + (h + 1) * Dh] for h in range(num_heads)]
    v_heads = [qkv_lo[:, 2 * E + h * Dh:2 * E + (h + 1) * Dh] for h in range(num_heads)]

    # Process q rows in tiles to bound the live (Tq, S) score matrix.
    for t0 in range(0, S, q_tile):
        tl = min(q_tile, S - t0)
        head_outs = []
        for h in range(num_heads):
            qh = qkv_lo[t0:t0 + tl, h * Dh:(h + 1) * Dh]              # (tl, Dh)
            # q . k^T : contract the shared Dh axis, no explicit transpose.
            s = lax.dot_general(qh, k_heads[h], (((1,), (1,)), ((), ())),
                                preferred_element_type=jnp.float32)   # (tl, S)
            s = s - jnp.max(s, axis=-1, keepdims=True)
            p = jnp.exp(s)
            p = p * pl.reciprocal(jnp.sum(p, axis=-1, keepdims=True), approx=True)
            head_outs.append(
                jnp.dot(p.astype(jnp.bfloat16), v_heads[h],
                        preferred_element_type=jnp.float32))          # (tl, Dh)
        # Concatenate heads -> one lane-dense (tl, E) store.
        tile_out = jnp.concatenate(head_outs, axis=-1)                # (tl, E)
        o_ref[0, t0:t0 + tl, :] = tile_out.astype(o_ref.dtype)


def prepare_plastic_mha_params(w_qkv, b_qkv, hebbian_trace, num_heads):
    """One-time (hoisted) weight prep: transpose, fold scale + trace diagonal.

    w_qkv: (3E, E) PyTorch nn.Linear weight; b_qkv: (3E,);
    hebbian_trace: (H, Dh, Dh).
    Returns (w_fused (E,3E) bf16, b_fused (1,3E) f32).
    """
    three_e, E = w_qkv.shape
    assert three_e == 3 * E
    Dh = E // num_heads
    scale = 1.0 / math.sqrt(Dh)

    # Diagonal of each head's hebbian trace, flattened head-major -> (E,)
    trace_diag = jnp.diagonal(hebbian_trace, axis1=-2, axis2=-1).reshape(E)
    col_scale = jnp.concatenate([
        jnp.full((E,), scale, dtype=jnp.float32),   # q columns: 1/sqrt(Dh)
        jnp.ones((E,), dtype=jnp.float32),          # k columns: unchanged
        trace_diag.astype(jnp.float32),             # v columns: hebbian diag
    ])                                              # (3E,)

    w_fused = (w_qkv.T.astype(jnp.float32) * col_scale[None, :]).astype(jnp.bfloat16)
    b_fused = (b_qkv.astype(jnp.float32) * col_scale).reshape(1, 3 * E)
    return w_fused, b_fused


def _vmem_limit_bytes(S, E, q_tile):
    bf16, f32 = 2, 4
    x_blk = S * E * bf16 * 2              # double-buffered input block
    o_blk = S * E * f32 * 2               # double-buffered output block
    w = E * 3 * E * bf16 * 2
    bias = 3 * E * f32 * 2
    qkv = S * 3 * E * (f32 + bf16)        # f32 accum + bf16 copy
    scores = q_tile * S * f32 * 3         # scores / probs / temporaries
    heads = q_tile * E * f32 * 2          # head outputs + concat
    est = x_blk + o_blk + w + bias + qkv + scores + heads
    return min(max(int(est * 1.5), 4 * 1024 * 1024), 100 * 1024 * 1024)


def plastic_mha_forward(x, w_fused, b_fused, num_heads, q_tile=512):
    """x: (B, S, E); w_fused: (E, 3E) bf16; b_fused: (1, 3E) f32."""
    B, S, E = x.shape
    q_tile = min(q_tile, S)

    out = pl.pallas_call(
        partial(_plastic_mha_kernel, num_heads=num_heads, q_tile=q_tile),
        out_shape=jax.ShapeDtypeStruct((B, S, E), x.dtype),
        grid_spec=pltpu.PrefetchScalarGridSpec(
            num_scalar_prefetch=0,
            grid=(B,),
            in_specs=[
                pl.BlockSpec((1, S, E), lambda b: (b, 0, 0)),      # x
                pl.BlockSpec((E, 3 * E), lambda b: (0, 0)),        # fused W (resident)
                pl.BlockSpec((1, 3 * E), lambda b: (0, 0)),        # fused bias
            ],
            out_specs=pl.BlockSpec((1, S, E), lambda b: (b, 0, 0)),
        ),
        compiler_params=pltpu.CompilerParams(
            dimension_semantics=("parallel",),
            vmem_limit_bytes=_vmem_limit_bytes(S, E, q_tile)),
    )(x.astype(jnp.bfloat16), w_fused, b_fused)
    return out


def _reference_forward(x, w_qkv, b_qkv, hebbian_trace, num_heads):
    """Pure-JAX f32 transcription of the PyTorch forward (eval mode)."""
    B, S, E = x.shape
    H = num_heads
    Dh = E // H
    qkv = x @ w_qkv.T + b_qkv
    q, k, v = jnp.split(qkv, 3, axis=-1)
    q = q.reshape(B, S, H, Dh).transpose(0, 2, 1, 3)
    k = k.reshape(B, S, H, Dh).transpose(0, 2, 1, 3)
    v = v.reshape(B, S, H, Dh).transpose(0, 2, 1, 3)
    scores = (q @ k.transpose(0, 1, 3, 2)) / math.sqrt(Dh)
    attn = jax.nn.softmax(scores, axis=-1)
    weighted_v = attn @ v                                      # (B, H, S, Dh)
    wv_blhd = weighted_v.transpose(0, 2, 1, 3)                 # (B, S, H, Dh)
    v_transformed = jnp.einsum('blhd,hdd->blhd', wv_blhd, hebbian_trace)
    return v_transformed.reshape(B, S, E)


if __name__ == "__main__":
    # Small shapes consistent with the module.
    batch, seq, embed_dim, num_heads = 2, 8, 32, 4
    head_dim = embed_dim // num_heads

    key = jax.random.PRNGKey(0)
    k_x, k_w, k_b, k_t = jax.random.split(key, 4)

    x = jax.random.normal(k_x, (batch, seq, embed_dim), dtype=jnp.float32)
    # nn.Linear(embed_dim, 3*embed_dim): weight (3E, E), bias (3E,)
    bound = 1.0 / math.sqrt(embed_dim)
    w_qkv = jax.random.uniform(k_w, (3 * embed_dim, embed_dim),
                               minval=-bound, maxval=bound, dtype=jnp.float32)
    b_qkv = jax.random.uniform(k_b, (3 * embed_dim,),
                               minval=-bound, maxval=bound, dtype=jnp.float32)
    # hebbian_trace parameter: identity init plus a small perturbation so the
    # diagonal fold is actually exercised (non-trivial diag values).
    hebbian_trace = (jnp.tile(jnp.eye(head_dim, dtype=jnp.float32)[None],
                              (num_heads, 1, 1))
                     + 0.05 * jax.random.normal(
                         k_t, (num_heads, head_dim, head_dim), dtype=jnp.float32))

    # One-time weight prep (hoisted out of the forward path).
    w_fused, b_fused = prepare_plastic_mha_params(w_qkv, b_qkv,
                                                  hebbian_trace, num_heads)

    out = plastic_mha_forward(x, w_fused, b_fused, num_heads)
    out = jax.block_until_ready(out)

    ref = _reference_forward(x, w_qkv, b_qkv, hebbian_trace, num_heads)
    assert out.shape == (batch, seq, embed_dim)
    # bf16 matmul operands (f32 accumulation) -> loose-ish tolerance vs f32 ref.
    assert jnp.allclose(out, ref, atol=2e-2, rtol=2e-2), (
        "mismatch vs reference, max abs err = "
        f"{float(jnp.max(jnp.abs(out - ref)))}")

    print("KERNEL_OK")
</pallas_src>

<mosaic_0001>
module attributes {stable_mosaic.version = 11 : i64} {
  func.func @_plastic_mha_kernel(%arg0: i32, %arg1: memref<1x8x32xbf16, #tpu.memory_space<vmem>>, %arg2: memref<32x96xbf16, #tpu.memory_space<vmem>>, %arg3: memref<1x96xf32, #tpu.memory_space<vmem>>, %arg4: memref<1x8x32xf32, #tpu.memory_space<vmem>>) attributes {dimension_semantics = [#tpu.dimension_semantics<parallel>], iteration_bounds = array<i64: 2>, scalar_prefetch = 0 : i64, scratch_operands = 0 : i64, tpu.core_type = #tpu.core_type<tc>, window_params = [{transform_indices = @transform_0, window_bounds = array<i64: 1, 8, 32>}, {pipeline_mode = #tpu.pipeline_mode<synchronous>, transform_indices = @transform_1, window_bounds = array<i64: 32, 96>}, {pipeline_mode = #tpu.pipeline_mode<synchronous>, transform_indices = @transform_2, window_bounds = array<i64: 1, 96>}, {transform_indices = @transform_3, window_bounds = array<i64: 1, 8, 32>}]} {
    %c0 = arith.constant 0 : index
    %c0_0 = arith.constant 0 : index
    %c0_1 = arith.constant 0 : index
    %0 = vector.load %arg1[%c0, %c0_0, %c0_1] : memref<1x8x32xbf16, #tpu.memory_space<vmem>>, vector<1x8x32xbf16>
    %1 = vector.shape_cast %0 : vector<1x8x32xbf16> to vector<8x32xbf16>
    %c0_2 = arith.constant 0 : index
    %c0_3 = arith.constant 0 : index
    %2 = vector.load %arg2[%c0_2, %c0_3] : memref<32x96xbf16, #tpu.memory_space<vmem>>, vector<32x96xbf16>
    %cst = arith.constant dense<0.000000e+00> : vector<8x96xf32>
    %3 = tpu.matmul %1, %2, %cst {dimension_numbers = #tpu.dot_dimension_numbers<[1], [0], [0], [1], [0, 0, 1, 1], [], []>} : vector<8x32xbf16>, vector<32x96xbf16>, vector<8x96xf32> -> vector<8x96xf32>
    %c0_4 = arith.constant 0 : index
    %c0_5 = arith.constant 0 : index
    %4 = vector.load %arg3[%c0_4, %c0_5] : memref<1x96xf32, #tpu.memory_space<vmem>>, vector<1x96xf32>
    %5 = vector.broadcast %4 : vector<1x96xf32> to vector<8x96xf32>
    %6 = arith.addf %3, %5 : vector<8x96xf32>
    %7 = arith.truncf %6 : vector<8x96xf32> to vector<8x96xbf16>
    %8 = vector.extract_strided_slice %7 {offsets = [0, 32], sizes = [8, 8], strides = [1, 1]} : vector<8x96xbf16> to vector<8x8xbf16>
    %9 = vector.extract_strided_slice %7 {offsets = [0, 40], sizes = [8, 8], strides = [1, 1]} : vector<8x96xbf16> to vector<8x8xbf16>
    %10 = vector.extract_strided_slice %7 {offsets = [0, 48], sizes = [8, 8], strides = [1, 1]} : vector<8x96xbf16> to vector<8x8xbf16>
    %11 = vector.extract_strided_slice %7 {offsets = [0, 56], sizes = [8, 8], strides = [1, 1]} : vector<8x96xbf16> to vector<8x8xbf16>
    %12 = vector.extract_strided_slice %7 {offsets = [0, 64], sizes = [8, 8], strides = [1, 1]} : vector<8x96xbf16> to vector<8x8xbf16>
    %13 = vector.extract_strided_slice %7 {offsets = [0, 72], sizes = [8, 8], strides = [1, 1]} : vector<8x96xbf16> to vector<8x8xbf16>
    %14 = vector.extract_strided_slice %7 {offsets = [0, 80], sizes = [8, 8], strides = [1, 1]} : vector<8x96xbf16> to vector<8x8xbf16>
    %15 = vector.extract_strided_slice %7 {offsets = [0, 88], sizes = [8, 8], strides = [1, 1]} : vector<8x96xbf16> to vector<8x8xbf16>
    %16 = vector.extract_strided_slice %7 {offsets = [0, 0], sizes = [8, 8], strides = [1, 1]} : vector<8x96xbf16> to vector<8x8xbf16>
    %cst_6 = arith.constant dense<0.000000e+00> : vector<8x8xf32>
    %17 = tpu.matmul %16, %8, %cst_6 {dimension_numbers = #tpu.dot_dimension_numbers<[1], [1], [0], [0], [0, 0, 1, 0], [], []>} : vector<8x8xbf16>, vector<8x8xbf16>, vector<8x8xf32> -> vector<8x8xf32>
    %cst_7 = arith.constant dense<0xFF800000> : vector<8xf32>
    %18 = vector.multi_reduction <maximumf>, %17, %cst_7 [1] : vector<8x8xf32> to vector<8xf32>
    %19 = vector.shape_cast %18 : vector<8xf32> to vector<8x1xf32>
    %20 = vector.broadcast %19 : vector<8x1xf32> to vector<8x8xf32>
    %21 = arith.subf %17, %20 : vector<8x8xf32>
    %22 = math.exp %21 : vector<8x8xf32>
    %cst_8 = arith.constant dense<0.000000e+00> : vector<8xf32>
    %23 = vector.multi_reduction <add>, %22, %cst_8 [1] : vector<8x8xf32> to vector<8xf32>
    %24 = vector.shape_cast %23 : vector<8xf32> to vector<8x1xf32>
    %25 = tpu.reciprocal %24 {approx = true} : vector<8x1xf32> -> vector<8x1xf32>
    %26 = vector.broadcast %25 : vector<8x1xf32> to vector<8x8xf32>
    %27 = arith.mulf %22, %26 : vector<8x8xf32>
    %28 = arith.truncf %27 : vector<8x8xf32> to vector<8x8xbf16>
    %cst_9 = arith.constant dense<0.000000e+00> : vector<8x8xf32>
    %29 = tpu.matmul %28, %12, %cst_9 {dimension_numbers = #tpu.dot_dimension_numbers<[1], [0], [0], [1], [0, 0, 1, 1], [], []>} : vector<8x8xbf16>, vector<8x8xbf16>, vector<8x8xf32> -> vector<8x8xf32>
    %30 = vector.extract_strided_slice %7 {offsets = [0, 8], sizes = [8, 8], strides = [1, 1]} : vector<8x96xbf16> to vector<8x8xbf16>
    %cst_10 = arith.constant dense<0.000000e+00> : vector<8x8xf32>
    %31 = tpu.matmul %30, %9, %cst_10 {dimension_numbers = #tpu.dot_dimension_numbers<[1], [1], [0], [0], [0, 0, 1, 0], [], []>} : vector<8x8xbf16>, vector<8x8xbf16>, vector<8x8xf32> -> vector<8x8xf32>
    %cst_11 = arith.constant dense<0xFF800000> : vector<8xf32>
    %32 = vector.multi_reduction <maximumf>, %31, %cst_11 [1] : vector<8x8xf32> to vector<8xf32>
    %33 = vector.shape_cast %32 : vector<8xf32> to vector<8x1xf32>
    %34 = vector.broadcast %33 : vector<8x1xf32> to vector<8x8xf32>
    %35 = arith.subf %31, %34 : vector<8x8xf32>
    %36 = math.exp %35 : vector<8x8xf32>
    %cst_12 = arith.constant dense<0.000000e+00> : vector<8xf32>
    %37 = vector.multi_reduction <add>, %36, %cst_12 [1] : vector<8x8xf32> to vector<8xf32>
    %38 = vector.shape_cast %37 : vector<8xf32> to vector<8x1xf32>
    %39 = tpu.reciprocal %38 {approx = true} : vector<8x1xf32> -> vector<8x1xf32>
    %40 = vector.broadcast %39 : vector<8x1xf32> to vector<8x8xf32>
    %41 = arith.mulf %36, %40 : vector<8x8xf32>
    %42 = arith.truncf %41 : vector<8x8xf32> to vector<8x8xbf16>
    %cst_13 = arith.constant dense<0.000000e+00> : vector<8x8xf32>
    %43 = tpu.matmul %42, %13, %cst_13 {dimension_numbers = #tpu.dot_dimension_numbers<[1], [0], [0], [1], [0, 0, 1, 1], [], []>} : vector<8x8xbf16>, vector<8x8xbf16>, vector<8x8xf32> -> vector<8x8xf32>
    %44 = vector.extract_strided_slice %7 {offsets = [0, 16], sizes = [8, 8], strides = [1, 1]} : vector<8x96xbf16> to vector<8x8xbf16>
    %cst_14 = arith.constant dense<0.000000e+00> : vector<8x8xf32>
    %45 = tpu.matmul %44, %10, %cst_14 {dimension_numbers = #tpu.dot_dimension_numbers<[1], [1], [0], [0], [0, 0, 1, 0], [], []>} : vector<8x8xbf16>, vector<8x8xbf16>, vector<8x8xf32> -> vector<8x8xf32>
    %cst_15 = arith.constant dense<0xFF800000> : vector<8xf32>
    %46 = vector.multi_reduction <maximumf>, %45, %cst_15 [1] : vector<8x8xf32> to vector<8xf32>
    %47 = vector.shape_cast %46 : vector<8xf32> to vector<8x1xf32>
    %48 = vector.broadcast %47 : vector<8x1xf32> to vector<8x8xf32>
    %49 = arith.subf %45, %48 : vector<8x8xf32>
    %50 = math.exp %49 : vector<8x8xf32>
    %cst_16 = arith.constant dense<0.000000e+00> : vector<8xf32>
    %51 = vector.multi_reduction <add>, %50, %cst_16 [1] : vector<8x8xf32> to vector<8xf32>
    %52 = vector.shape_cast %51 : vector<8xf32> to vector<8x1xf32>
    %53 = tpu.reciprocal %52 {approx = true} : vector<8x1xf32> -> vector<8x1xf32>
    %54 = vector.broadcast %53 : vector<8x1xf32> to vector<8x8xf32>
    %55 = arith.mulf %50, %54 : vector<8x8xf32>
    %56 = arith.truncf %55 : vector<8x8xf32> to vector<8x8xbf16>
    %cst_17 = arith.constant dense<0.000000e+00> : vector<8x8xf32>
    %57 = tpu.matmul %56, %14, %cst_17 {dimension_numbers = #tpu.dot_dimension_numbers<[1], [0], [0], [1], [0, 0, 1, 1], [], []>} : vector<8x8xbf16>, vector<8x8xbf16>, vector<8x8xf32> -> vector<8x8xf32>
    %58 = vector.extract_strided_slice %7 {offsets = [0, 24], sizes = [8, 8], strides = [1, 1]} : vector<8x96xbf16> to vector<8x8xbf16>
    %cst_18 = arith.constant dense<0.000000e+00> : vector<8x8xf32>
    %59 = tpu.matmul %58, %11, %cst_18 {dimension_numbers = #tpu.dot_dimension_numbers<[1], [1], [0], [0], [0, 0, 1, 0], [], []>} : vector<8x8xbf16>, vector<8x8xbf16>, vector<8x8xf32> -> vector<8x8xf32>
    %cst_19 = arith.constant dense<0xFF800000> : vector<8xf32>
    %60 = vector.multi_reduction <maximumf>, %59, %cst_19 [1] : vector<8x8xf32> to vector<8xf32>
    %61 = vector.shape_cast %60 : vector<8xf32> to vector<8x1xf32>
    %62 = vector.broadcast %61 : vector<8x1xf32> to vector<8x8xf32>
    %63 = arith.subf %59, %62 : vector<8x8xf32>
    %64 = math.exp %63 : vector<8x8xf32>
    %cst_20 = arith.constant dense<0.000000e+00> : vector<8xf32>
    %65 = vector.multi_reduction <add>, %64, %cst_20 [1] : vector<8x8xf32> to vector<8xf32>
    %66 = vector.shape_cast %65 : vector<8xf32> to vector<8x1xf32>
    %67 = tpu.reciprocal %66 {approx = true} : vector<8x1xf32> -> vector<8x1xf32>
    %68 = vector.broadcast %67 : vector<8x1xf32> to vector<8x8xf32>
    %69 = arith.mulf %64, %68 : vector<8x8xf32>
    %70 = arith.truncf %69 : vector<8x8xf32> to vector<8x8xbf16>
    %cst_21 = arith.constant dense<0.000000e+00> : vector<8x8xf32>
    %71 = tpu.matmul %70, %15, %cst_21 {dimension_numbers = #tpu.dot_dimension_numbers<[1], [0], [0], [1], [0, 0, 1, 1], [], []>} : vector<8x8xbf16>, vector<8x8xbf16>, vector<8x8xf32> -> vector<8x8xf32>
    %72 = tpu.concatenate %29, %43, %57, %71 in 1 : vector<8x8xf32>, vector<8x8xf32>, vector<8x8xf32>, vector<8x8xf32> -> vector<8x32xf32>
    %c0_22 = arith.constant 0 : index
    %c0_23 = arith.constant 0 : index
    %c0_24 = arith.constant 0 : index
    %73 = vector.load %arg4[%c0_22, %c0_23, %c0_24] : memref<1x8x32xf32, #tpu.memory_space<vmem>>, vector<1x8x32xf32>
    %74 = vector.shape_cast %73 : vector<1x8x32xf32> to vector<8x32xf32>
    %75 = vector.shape_cast %72 : vector<8x32xf32> to vector<1x8x32xf32>
    tpu.vector_store %arg4[%c0_22, %c0_23, %c0_24], %75 {strides = array<i32>} : memref<1x8x32xf32, #tpu.memory_space<vmem>>, vector<1x8x32xf32>,
    return
  }
  func.func @transform_0(%arg0: i32) -> (i32, i32, i32) {
    %c0_i32 = arith.constant 0 : i32
    %c0_i32_0 = arith.constant 0 : i32
    %c0_i32_1 = arith.constant 0 : i32
    return %arg0, %c0_i32, %c0_i32_0 : i32, i32, i32
  }
  func.func @transform_1(%arg0: i32) -> (i32, i32) {
    %c0_i32 = arith.constant 0 : i32
    %c0_i32_0 = arith.constant 0 : i32
    %c0_i32_1 = arith.constant 0 : i32
    return %c0_i32, %c0_i32_0 : i32, i32
  }
  func.func @transform_2(%arg0: i32) -> (i32, i32) {
    %c0_i32 = arith.constant 0 : i32
    %c0_i32_0 = arith.constant 0 : i32
    %c0_i32_1 = arith.constant 0 : i32
    return %c0_i32, %c0_i32_0 : i32, i32
  }
  func.func @transform_3(%arg0: i32) -> (i32, i32, i32) {
    %c0_i32 = arith.constant 0 : i32
    %c0_i32_0 = arith.constant 0 : i32
    %c0_i32_1 = arith.constant 0 : i32
    return %arg0, %c0_i32, %c0_i32_0 : i32, i32, i32
  }
}

</mosaic_0001>

<bundles_post_ra>
// kernel: tpu_custom_call.1
= control target key start
LH: loop header
LB: loop body
LE: loop exit
PB: predicated region body
PF: predicated region fallthrough
CT: control target
= control target key end

     0   :  { %8 = vsyncpa [#allocation3], 0  ;;  %s1458_s0 = inlined_call_operand.hbm [shape: bf16[2,8,32], index: 0, kind: input, shape index: {}]   ;;  %s1459_s1 = inlined_call_operand.hbm [shape: bf16[32,96], index: 1, kind: input, shape index: {}]   ;;  %s1460_s2 = inlined_call_operand.vmem [shape: f32[1,96], index: 2, kind: input, shape index: {}]   ;;  %s1461_s3 = inlined_call_operand.hbm [shape: f32[2,8,32], index: 3, kind: output, shape index: {}]  }
   0x1   :  { %10 = vsyncpa [#allocation3 + $0x1], 0 }
   0x2   :  { %11 = vsyncpa [#allocation6], 0 }
   0x3   :  { %12 = vsyncpa [#allocation4], 0 }
   0x4   :  { %14 = vsyncpa [#allocation4 + $0x1], 0  ;;  %s1189_s12 = smov 0   ;;  %s1191_s13 = smov 0  }
   0x5   :  { %s1193_s14 = smov 0   ;;  %s1195_s15 = smov 0  }
   0x6 LB: > { %s1210_s16 = sadd.s32 4294967295, %s1146_s15   ;;  %s824_s17 = sadd.s32 4294967294, %s1146_s15   ;;  %s1146_s15 = sphi %s1195_s15, %s1481_s15   ;;  %s1142_s14 = sphi %s1193_s14, %s1480_s14   ;;  %s1138_s13 = sphi %s1191_s13, %s1479_s13   ;;  %s1134_s12 = sphi %s1189_s12, %s1478_s12  }
   0x7   : > { %p40_p0 = scmp.ne.s32.totalorder %s1138_s13, %s1134_s12  ;;  %p1462_p1 = scmp.eq.s32.totalorder %s1210_s16, 0 }
   0x8   : > { %p112_p3 = scmp.eq.s32.totalorder %s824_s17, 1  ;;  %p825_p5 = scmp.ge.s32.totalorder %s1146_s15, 1 }
   0x9   : > { %p1219_p4 = por %p1462_p1, %p40_p0  ;;  %p119_p7 = scmp.lt.s32.totalorder %s1146_s15, 3 }
   0xa   : > { %p1224_p6 = por %p112_p3, %p40_p0  ;;  %s1148_s21 = smov [#allocation5]  }
   0xb   : > { %s1465_s18 = scalar_select %p1219_p4, 1, 0 }
   0xc   : > { %s1466_s19 = scalar_select %p1224_p6, 1, 0 }
   0xd   : > { %p1229_p8 = pnand %p825_p5, %p119_p7  ;;  %s131_s22 = sshll.u32 %s1148_s21, 4  ;;  %s1233_s22 = int_to_ptr.vmem [resolvable:$true] %s131_s22 }
   0xe   : > { %s1245_s24 = sadd.s32 1, %s1146_s15   ;;  %s27_s25 = sadd.s32 1, %s1142_s14 }
   0xf   : > { %s1467_s20 = scalar_select %p1229_p8, 1, 0 }
  0x10   : > { %p933_p9 = pneg %p1229_p8  ;;  %s24_s26 = ssub.s32 %s1146_s15, %s1245_s24 }
  0x11   : > { %s1018_s29 = scalar_lea.hbm %s1459_s1, 256 }
  0x12   : > { %p1240_p11 = pnand %p933_p9, %p1462_p1  ;;  %p1019_p12 = scmp.ne.s32.totalorder %s1459_s1, %s1018_s29 }
  0x13   : > { %p1025_p5 = scmp.lt.u32.totalorder %s1018_s29, %s1459_s1 }
  0x14   : > { %p1020_p13 = pneg %p1240_p11 }
  0x16   : > { %p1021_p0 = pnand %p1020_p13, %p1019_p12 }
  0x18   : > { %p1022_p3 = pneg %p1021_p0 }
  0x1a   : > { %p1027_p7 = pnand %p1025_p5, %p1022_p3 }
  0x1c   : > { %1030 = shalt.err (!%p1027_p7)
}
  0x1d   : > { %s1031_s7 = scalar_lea.vmem %s1233_s22, 256  ;;  %p1039_p2 = scmp.lt.s32.totalorder %s1233_s22, %s1233_s22 }
  0x1e   : > { %p1032_p9 = scmp.ne.s32.totalorder %s1233_s22, %s1031_s7  ;;  %p1040_p6 = scmp.lt.s32.totalorder %s1031_s7, %s1031_s7 }
  0x20   : > { %p1034_p10 = pnand %p1032_p9, %p1020_p13  ;;  %p1041_p4 = por %p1040_p6, %p1039_p2 }
  0x22   : > { %p1035_p1 = pneg %p1034_p10 }
  0x24   : > { %p1042_p8 = pnand %p1041_p4, %p1035_p1 }
  0x26   : > { %1045 = shalt.err (!%p1042_p8)
}
  0x27   : > { %s1149_s8 = smov 64   ;;  %s1150_s9 = smov 4  }
  0x28   : > { %936 = dma.hbm_to_vmem [thread:$0]  (!%p1240_p11), %s1459_s1, 256, %s1233_s22, [#allocation6], %s1149_s8, %s1149_s8, %s1150_s9  }
  0x29   : > { %p25_p2 = scmp.eq.s32.totalorder %s24_s26, 0  ;;  %p34_p1 = scmp.ne.s32.totalorder %s1142_s14, %s1138_s13 }
  0x2a   : > { %p35_p4 = scmp.eq.s32.totalorder %s1146_s15, 0  ;;  %p946_p6 = scmp.lt.s32.totalorder %s1146_s15, 2 }
  0x2b   : > { %s1276_s17 = scalar_select %p25_p2, %s1142_s14, %s27_s25  }
  0x2c   : > { %p36_p8 = por %p35_p4, %p34_p1  ;;  %p1469_p10 = scmp.eq.s32.totalorder %s1210_s16, 1 }
  0x2d   : > { %s148_s27 = sand.u32 1, %s1142_s14   ;;  %s829_s28 = sshll.u32 %s1146_s15, 6 }
  0x2e   : > { %p1280_p12 = por %p1469_p10, %p34_p1  ;;  %s828_s29 = sshll.u32 %s148_s27, 2 }
  0x2f   : > { %s1289_s4 = scalar_lea.hbm %s1458_s0, %s829_s28  ;;  %s152_s22 = scalar_lea.vmem [#allocation2], %s828_s29 }
  0x30   : > { %s159_s25 = sshll.u32 %s152_s22, 4  ;;  %p1291_p11 = pnand %p946_p6, %p36_p8  ;;  %s1295_s25 = int_to_ptr.vmem [resolvable:$true] %s159_s25 }
  0x31   : > { %s149_s5 = scalar_lea.sflag [#allocation3], %s148_s27  ;;  %s1046_s6 = scalar_lea.hbm %s1289_s4, 64 }
  0x32   : > { %p1047_p13 = scmp.ne.s32.totalorder %s1289_s4, %s1046_s6  ;;  %p1048_p0 = pneg %p1291_p11 }
  0x33   : > { %s1051_s9 = scalar_lea.hbm %s1458_s0, 128  ;;  %p1052_p7 = scmp.lt.u32.totalorder %s1289_s4, %s1458_s0 }
  0x34   : > { %p1049_p3 = pnand %p1048_p0, %p1047_p13  ;;  %p1053_p9 = scmp.lt.u32.totalorder %s1051_s9, %s1046_s6 }
  0x35   : > { %p1055_p1 = scmp.lt.u32.totalorder %s1046_s6, %s1289_s4 }
  0x36   : > { %p1050_p5 = pneg %p1049_p3  ;;  %p1054_p2 = por %p1053_p9, %p1052_p7 }
  0x38   : > { %p1056_p4 = por %p1055_p1, %p1054_p2 }
  0x3a   : > { %p1057_p6 = pnand %p1056_p4, %p1050_p5 }
  0x3c   : > { %1060 = shalt.err (!%p1057_p6)
}
  0x3d   : > { %s1061_s27 = scalar_lea.vmem %s1295_s25, 64  ;;  %s1151_s28 = smov [#allocation2]  }
  0x3e   : > { %p1062_p8 = scmp.ne.s32.totalorder %s1295_s25, %s1061_s27  ;;  %s1066_s29 = sshll.u32 %s1151_s28, 4  ;;  %s1067_s29 = int_to_ptr.vmem [resolvable:$false] %s1066_s29 }
  0x3f   : > { %s1068_s23 = scalar_lea.vmem %s1067_s29, 128  ;;  %p1069_p3 = scmp.lt.s32.totalorder %s1295_s25, %s1067_s29 }
  0x40   : > { %p1064_p10 = pnand %p1062_p8, %p1048_p0  ;;  %p1070_p7 = scmp.lt.s32.totalorder %s1068_s23, %s1061_s27 }
  0x42   : > { %p1065_p13 = pneg %p1064_p10  ;;  %p1071_p9 = por %p1070_p7, %p1069_p3 }
  0x44   : > { %p1072_p2 = pnand %p1071_p9, %p1065_p13 }
  0x46   : > { %1075 = shalt.err (!%p1072_p2)
}
  0x47   : > { %940 = dma.hbm_to_vmem [thread:$0]  (!%p1291_p11), %s1289_s4, 64, %s1295_s25, %s149_s5  }
  0x48   : > { %p1472_p5 = scmp.ne.s32.totalorder %s1467_s20, 0 }
  0x49   : > { %s1325_s30 = sand.u32 (!%p1472_p5), 1, %s1138_s13   ;;  %p1473_p0 = scmp.ne.s32.totalorder (!%p1472_p5), %s1465_s18, 0 }
  0x4a   : > { %168 = sbr.rel (%p1472_p5) target bundleno = 1366 (0x556), region = 32  ;;  %s831_s22 = sshll.u32 (!%p1472_p5), %s1325_s30, 2 }
  0x4b   : > { %s171_s6 = scalar_lea.sflag (!%p1472_p5), [#allocation3], %s1325_s30  ;;  %s174_s7 = scalar_lea.vmem (!%p1472_p5), [#allocation2], %s831_s22 }
  0x51   : > { %1121 = dma.done.wait (%p1473_p0), %s171_s6, 64  }
  0x52   : > { %1123 = vsyncadd (%p1473_p0), %s171_s6, 4294967232  ;;  %p1474_p1 = scmp.eq.s32.totalorder %s1210_s16, 0 }
  0x54   : > { %1125 = dma.done.wait (%p1474_p1), [#allocation6], 256   ;;  %p1475_p11 = pmov %p1474_p1 }
  0x55   : > { %v1152_v0 = vmov 0.0   ;;  %vm1153_vm0 = vmmov 0   ;;  %v1000_v1 = vld [vmem:[#allocation5] sm:$0xff]   ;;  %v1001_v2 = vld [vmem:[#allocation5 + $0x8] sm:$0xff]   ;;  %v202_v3 = vld [vmem:[%s174_s7] sm:$0xf] }
  0x56   : > { %1127 = vsyncadd (%p1475_p11), [#allocation6], 4294967040  ;;  %869 = vmatprep.subr.bf16.mxu0 %v1152_v0  ;;  %873 = vmatprep.mubr.msk.bf16.mxu0 %vm1153_vm0, %v1152_v0  ;;  %vm226_vm1 = vcmask 261120   ;;  %v834_v4 = vld [vmem:[%s1460_s2] ss:$0 sm:$0xff]  ;;  %s1154_s4 = smov 120  }
  0x57   : > { %877 = vmatprep.subr.bf16.mxu1 %v1152_v0  ;;  %879 = vmatprep.mubr.msk.bf16.mxu1 %vm1153_vm0, %v1152_v0  ;;  %s1155_s25 = smov 96   ;;  %s1156_s26 = smov 80   ;;  %vm274_vm2 = vcmask 64512   ;;  %vm338_vm3 = vcmask 1043456   ;;  %vm725_vm4 = vcmask 130048   ;;  %vm727_vm5 = vcmask 195584  }
  0x58   : > { %870 = vmatpush3.bf16.msra.mxu0 %v1000_v1  ;;  %s1157_s5 = smov 88   ;;  %s1158_s8 = smov 72  }
  0x59   : > { %871 = vmatprep.subr.bf16.mxu0 %v1152_v0  ;;  %s1159_s9 = smov 112   ;;  %s1160_s10 = smov 104  }
  0x5a   : > { %s1161_s11 = smov 56   ;;  %s1162_s27 = smov 64  }
  0x5b   : > { %s1163_s28 = smov 40   ;;  %s1164_s29 = smov 48  }
  0x5c   : > { %872 = vmatpush3.bf16.msra.mxu0 %v1001_v2  ;;  %s1165_s23 = smov 8   ;;  %s1166_s22 = smov 16  }
  0x5d   : > { %883 = vmatprep.subr.bf16.mxu0 %v1152_v0  ;;  %s1167_s6 = smov 24   ;;  %s833_s7 = sshll.u32 %s1325_s30, 3 }
  0x5e   : > { %s847_s18 = sshll.u32 %s1210_s16, 7  ;;  %s200_s20 = scalar_lea.vmem [#allocation7], %s833_s7 }
  0x5f   : > { %874 = vmatmul.mubr.msk.bf16.vlgmr.msra.gmra.mrb[0].mxu0 %vm226_vm1, %v202_v3  ;;  %s731_s16 = scalar_lea.sflag [#allocation4], %s1325_s30 }
  0x60   : > { %885 = vmatprep.mubr.msk.bf16.mxu0 %vm1153_vm0, %v1152_v0 }
 0x132   : > { %v264_v5 = vpop.f32.mrb[0].mxu0 }
 0x133   : > { %v265_v6 = vadd.f32 %v834_v4, %v264_v5  ;;  %v875_v7 = vpop.f32.mrb[1].mxu0 }
 0x134   : > { %v267_v8 = vpop.f32.mrb[2].mxu0 }
 0x135   : > { %v1351_v9 = vpack.c.bf16 %v265_v6, %v265_v6  ;;  %v876_v10 = vpop.f32.mrb[3].mxu0 }
 0x137   : > { %382 = vrot.lane.b32.xlu1 %v1351_v9, %s1154_s4  ;;  %272 = vrot.lane.b32.xlu0 %v1351_v9, %s1155_s25  ;;  %s744_s4 = sshll.u32 %s200_s20, 4  ;;  %s1415_s4 = int_to_ptr.vmem [resolvable:$true] %s744_s4 }
 0x13b   : > { %494 = vrot.lane.b32.xlu1 %v1351_v9, %s1156_s26  ;;  %384 = vrot.lane.b32.xlu0 %v1351_v9, %s1157_s5  ;;  %s1413_s5 = scalar_lea.hbm %s1461_s3, %s847_s18 }
 0x13f   : > { %604 = vrot.lane.b32.xlu1 %v1351_v9, %s1158_s8  ;;  %492 = vrot.lane.b32.xlu0 %v1351_v9, %s1159_s9  ;;  %s1076_s8 = scalar_lea.vmem %s1415_s4, 128  ;;  %s1168_s9 = smov [#allocation7]  }
 0x140   : > { %p1077_p4 = scmp.ne.s32.totalorder %s1415_s4, %s1076_s8 }
 0x142   : > { %p1078_p6 = pnand %p1077_p4, %p1280_p12 }
 0x143   : > { %602 = vrot.lane.b32.xlu0 %v1351_v9, %s1160_s10  ;;  %s1080_s10 = sshll.u32 %s1168_s9, 4  ;;  %s1081_s10 = int_to_ptr.vmem [resolvable:$false] %s1080_s10 }
 0x144   : > { %p1079_p8 = pneg %p1078_p6  ;;  %p1083_p10 = scmp.lt.s32.totalorder %s1415_s4, %s1081_s10 }
 0x1a9   : > { %v273_v11 = vpop.permute.xlu0 %272  ;;  %v383_v14 = vpop.permute.xlu1 %382 }
 0x1aa   : > { %v279_v12 = vsel %vm274_vm2, %v273_v11, 0 }
 0x1ab   : > { %878 = vmatpush3.bf16.xpose.msra.mxu1 %v279_v12 }
 0x1ac   : > { %889 = vmatprep.subr.bf16.mxu1 %v1152_v0 }
 0x1ad   : > { %v385_v13 = vpop.permute.xlu0 %384  ;;  %v495_v16 = vpop.permute.xlu1 %494 }
 0x1ae   : > { %v390_v15 = vsel %vm274_vm2, %v385_v13, 0  ;;  %v500_v17 = vsel %vm274_vm2, %v495_v16, 0 }
 0x1b1   : > { %v605_v18 = vpop.permute.xlu1 %604  ;;  %v493_v19 = vpop.permute.xlu0 %492 }
 0x1b2   : > { %880 = vmatmul.mubr.msk.bf16.vlgmr.msra.gmra.mrb[0].mxu1 %vm274_vm2, %v1351_v9  ;;  %v610_v20 = vsel %vm274_vm2, %v605_v18, 0 }
 0x1b3   : > { %890 = vmatpush3.bf16.xpose.msra.mxu1 %v390_v15  ;;  %891 = vmatprep.mubr.msk.bf16.mxu1 %vm1153_vm0, %v1152_v0 }
 0x1b4   : > { %901 = vmatprep.subr.bf16.mxu1 %v1152_v0 }
 0x1b5   : > { %v603_v21 = vpop.permute.xlu0 %602 }
 0x1ba   : > { %892 = vmatmul.mubr.msk.bf16.vlgmr.msra.gmra.mrb[4].mxu1 %vm274_vm2, %v383_v14 }
 0x1bb   : > { %902 = vmatpush3.bf16.xpose.msra.mxu1 %v500_v17  ;;  %903 = vmatprep.mubr.msk.bf16.mxu1 %vm1153_vm0, %v1152_v0 }
 0x1bc   : > { %913 = vmatprep.subr.bf16.mxu1 %v1152_v0 }
 0x1c2   : > { %904 = vmatmul.mubr.msk.bf16.vlgmr.msra.gmra.mrb[8].mxu1 %vm274_vm2, %v493_v19 }
 0x1c3   : > { %914 = vmatpush3.bf16.xpose.msra.mxu1 %v610_v20  ;;  %915 = vmatprep.mubr.msk.bf16.mxu1 %vm1153_vm0, %v1152_v0 }
 0x1ca   : > { %916 = vmatmul.mubr.msk.bf16.vlgmr.msra.gmra.mrb[12].mxu1 %vm274_vm2, %v603_v21 }
 0x285   : > { %v315_v22 = vpop.f32.mrb[0].mxu1 }
 0x286   : > { %v881_v23 = vpop.f32.mrb[1].mxu1  ;;  %v321_v24 = vsel %vm274_vm2, %v315_v22, -inf }
 0x287   : > { %322 = vmax.xlane.f32.xlu1 %v321_v24  ;;  %v318_v25 = vpop.f32.mrb[2].mxu1 }
 0x288   : > { %v882_v26 = vpop.f32.mrb[3].mxu1 }
 0x28d   : > { %v426_v27 = vpop.f32.mrb[4].mxu1 }
 0x28e   : > { %v893_v28 = vpop.f32.mrb[5].mxu1  ;;  %v432_v29 = vsel %vm274_vm2, %v426_v27, -inf }
 0x28f   : > { %433 = vmax.xlane.f32.xlu0 %v432_v29  ;;  %v429_v30 = vpop.f32.mrb[6].mxu1 }
 0x290   : > { %v894_v31 = vpop.f32.mrb[7].mxu1 }
 0x295   : > { %v536_v32 = vpop.f32.mrb[8].mxu1 }
 0x296   : > { %v905_v33 = vpop.f32.mrb[9].mxu1  ;;  %v542_v34 = vsel %vm274_vm2, %v536_v32, -inf }
 0x297   : > { %543 = vmax.xlane.f32.xlu0 %v542_v34  ;;  %v539_v35 = vpop.f32.mrb[10].mxu1 }
 0x298   : > { %v906_v36 = vpop.f32.mrb[11].mxu1 }
 0x29d   : > { %v646_v37 = vpop.f32.mrb[12].mxu1 }
 0x29e   : > { %v917_v38 = vpop.f32.mrb[13].mxu1  ;;  %v652_v39 = vsel %vm274_vm2, %v646_v37, -inf }
 0x29f   : > { %653 = vmax.xlane.f32.xlu1 %v652_v39  ;;  %v649_v40 = vpop.f32.mrb[14].mxu1 }
 0x2a0   : > { %v918_v41 = vpop.f32.mrb[15].mxu1 }
 0x314   : > { %v323_v42 = vpop.xlane.xlu1 %322 }
 0x315   : > { %v324_v43 = vsub.f32 %v315_v22, %v323_v42 }
 0x317   : > { %v325_v44 = vmul.f32 1.442695, %v324_v43 }
 0x319   : > { %1002 = vpow2.f32 %v325_v44 }
 0x31c   : > { %v434_v45 = vpop.xlane.xlu0 %433 }
 0x31d   : > { %v435_v46 = vsub.f32 %v426_v27, %v434_v45 }
 0x31f   : > { %v436_v47 = vmul.f32 1.442695, %v435_v46 }
 0x321   : > { %1004 = vpow2.f32 %v436_v47 }
 0x323   : > { %v1003_v48 = vpop.eup %1002 }
 0x324   : > { %v544_v49 = vpop.xlane.xlu0 %543  ;;  %v327_v50 = vsel %vm274_vm2, %v1003_v48, 0.0 }
 0x325   : > { %v545_v51 = vsub.f32 %v536_v32, %v544_v49  ;;  %328 = vadd.xlane.f32.xlu0 %v327_v50 }
 0x327   : > { %v546_v52 = vmul.f32 1.442695, %v545_v51 }
 0x329   : > { %1006 = vpow2.f32 %v546_v52 }
 0x32b   : > { %v1005_v53 = vpop.eup %1004 }
 0x32c   : > { %v438_v54 = vsel %vm274_vm2, %v1005_v53, 0.0  ;;  %v654_v57 = vpop.xlane.xlu1 %653 }
 0x32d   : > { %439 = vadd.xlane.f32.xlu1 %v438_v54  ;;  %v655_v58 = vsub.f32 %v646_v37, %v654_v57 }
 0x32f   : > { %v656_v59 = vmul.f32 1.442695, %v655_v58 }
 0x331   : > { %1008 = vpow2.f32 %v656_v59 }
 0x333   : > { %v1007_v55 = vpop.eup %1006 }
 0x334   : > { %v548_v56 = vsel %vm274_vm2, %v1007_v55, 0.0 }
 0x335   : > { %549 = vadd.xlane.f32.xlu0 %v548_v56 }
 0x33b   : > { %v1009_v60 = vpop.eup %1008 }
 0x33c   : > { %v658_v61 = vsel %vm274_vm2, %v1009_v60, 0.0 }
 0x33e   : > { %444 = vrot.lane.b32.xlu1 %v1351_v9, %s1161_s11  ;;  %s1082_s11 = scalar_lea.vmem %s1081_s10, 256 }
 0x33f   : > { %p1084_p13 = scmp.lt.s32.totalorder %s1082_s11, %s1076_s8 }
 0x341   : > { %p1085_p3 = por %p1084_p13, %p1083_p10 }
 0x343   : > { %p1086_p7 = pnand %p1085_p3, %p1079_p8 }
 0x34b   : > { %333 = vrot.lane.b32.xlu0 %v1351_v9, %s1162_s27 }
 0x34f   : > { %664 = vrot.lane.b32.xlu0 %v1351_v9, %s1163_s28 }
 0x362   : > { %659 = vadd.xlane.f32.xlu1 %v658_v61 }
 0x373   : > { %554 = vrot.lane.b32.xlu1 %v1351_v9, %s1164_s29 }
 0x3b2   : > { %v329_v62 = vpop.xlane.xlu0 %328 }
 0x3b3   : > { %1010 = vrcp.f32 %v329_v62 }
 0x3ba   : > { %v440_v63 = vpop.xlane.xlu1 %439 }
 0x3bb   : > { %1012 = vrcp.f32 %v440_v63 }
 0x3bd   : > { %v1011_v1 = vpop.eup %1010 }
 0x3be   : > { %v331_v3 = vmul.f32 %v1011_v1, %v1003_v48  ;;  %v445_v6 = vpop.permute.xlu1 %444 }
 0x3bf   : > { %v450_v10 = vsel %vm338_vm3, %v445_v6, 0 }
 0x3c0   : > { %v332_v7 = vpack.c.bf16 %v331_v3, %v331_v3 }
 0x3c2   : > { %v550_v2 = vpop.xlane.xlu0 %549 }
 0x3c3   : > { %1014 = vrcp.f32 %v550_v2 }
 0x3c5   : > { %v1013_v8 = vpop.eup %1012 }
 0x3c6   : > { %v334_v4 = vpop.permute.xlu0 %333  ;;  %v442_v9 = vmul.f32 %v1013_v8, %v1005_v53 }
 0x3c7   : > { %v340_v5 = vsel %vm338_vm3, %v334_v4, 0 }
 0x3c8   : > { %884 = vmatpush3.bf16.msra.mxu0 %v340_v5  ;;  %v443_v11 = vpack.c.bf16 %v442_v9, %v442_v9 }
 0x3c9   : > { %895 = vmatprep.subr.bf16.mxu0 %v1152_v0 }
 0x3ca   : > { %v665_v17 = vpop.permute.xlu0 %664 }
 0x3cb   : > { %886 = vmatmul.mubr.msk.bf16.vlgmr.msra.gmra.mrb[4].mxu0 %vm274_vm2, %v332_v7  ;;  %v670_v19 = vsel %vm338_vm3, %v665_v17, 0 }
 0x3cc   : > { %896 = vmatpush3.bf16.msra.mxu0 %v450_v10  ;;  %897 = vmatprep.mubr.msk.bf16.mxu0 %vm1153_vm0, %v1152_v0 }
 0x3cd   : > { %907 = vmatprep.subr.bf16.mxu0 %v1152_v0  ;;  %v1015_v12 = vpop.eup %1014 }
 0x3ce   : > { %v552_v14 = vmul.f32 %v1015_v12, %v1007_v55 }
 0x3d0   : > { %v553_v18 = vpack.c.bf16 %v552_v14, %v552_v14 }
 0x3d3   : > { %898 = vmatmul.mubr.msk.bf16.vlgmr.msra.gmra.mrb[8].mxu0 %vm274_vm2, %v443_v11 }
 0x3d4   : > { %909 = vmatprep.mubr.msk.bf16.mxu0 %vm1153_vm0, %v1152_v0 }
 0x3ef   : > { %v660_v13 = vpop.xlane.xlu1 %659 }
 0x3f0   : > { %1016 = vrcp.f32 %v660_v13 }
 0x3f3   : > { %v555_v15 = vpop.permute.xlu1 %554 }
 0x3f4   : > { %v560_v16 = vsel %vm338_vm3, %v555_v15, 0 }
 0x3f5   : > { %908 = vmatpush3.bf16.msra.mxu0 %v560_v16 }
 0x3f6   : > { %919 = vmatprep.subr.bf16.mxu0 %v1152_v0 }
 0x3f8   : > { %910 = vmatmul.mubr.msk.bf16.vlgmr.msra.gmra.mrb[12].mxu0 %vm274_vm2, %v553_v18 }
 0x3f9   : > { %920 = vmatpush3.bf16.msra.mxu0 %v670_v19  ;;  %921 = vmatprep.mubr.msk.bf16.mxu0 %vm1153_vm0, %v1152_v0 }
 0x3fa   : > { %v1017_v20 = vpop.eup %1016 }
 0x3fb   : > { %v662_v21 = vmul.f32 %v1017_v20, %v1009_v60 }
 0x3fd   : > { %v663_v22 = vpack.c.bf16 %v662_v21, %v662_v21 }
 0x400   : > { %922 = vmatmul.mubr.msk.bf16.vlgmr.msra.gmra.mrb[16].mxu0 %vm274_vm2, %v663_v22 }
 0x49e   : > { %v376_v23 = vpop.f32.mrb[4].mxu0 }
 0x49f   : > { %v887_v24 = vpop.f32.mrb[5].mxu0 }
 0x4a0   : > { %v379_v25 = vpop.f32.mrb[6].mxu0 }
 0x4a1   : > { %v888_v26 = vpop.f32.mrb[7].mxu0 }
 0x4a6   : > { %v486_v27 = vpop.f32.mrb[8].mxu0 }
 0x4a7   : > { %713 = vrot.lane.b32.xlu1 %v486_v27, %s1165_s23  ;;  %v899_v28 = vpop.f32.mrb[9].mxu0 }
 0x4a8   : > { %v489_v29 = vpop.f32.mrb[10].mxu0 }
 0x4a9   : > { %v900_v30 = vpop.f32.mrb[11].mxu0 }
 0x4cb   : > { %v596_v31 = vpop.f32.mrb[12].mxu0 }
 0x4cc   : > { %717 = vrot.lane.b32.xlu0 %v596_v31, %s1166_s22  ;;  %v911_v0 = vpop.f32.mrb[13].mxu0 }
 0x4cd   : > { %v599_v32 = vpop.f32.mrb[14].mxu0 }
 0x4ce   : > { %v912_v33 = vpop.f32.mrb[15].mxu0 }
 0x4d3   : > { %v706_v34 = vpop.f32.mrb[16].mxu0 }
 0x4d4   : > { %721 = vrot.lane.b32.xlu1 %v706_v34, %s1167_s6  ;;  %v923_v35 = vpop.f32.mrb[17].mxu0 }
 0x4d5   : > { %v709_v36 = vpop.f32.mrb[18].mxu0 }
 0x4d6   : > { %v924_v37 = vpop.f32.mrb[19].mxu0 }
 0x519   : > { %v714_v38 = vpop.permute.xlu1 %713 }
 0x51a   : > { %v724_v40 = vsel %vm274_vm2, %v376_v23, %v714_v38 }
 0x53e   : > { %v718_v39 = vpop.permute.xlu0 %717 }
 0x53f   : > { %v726_v41 = vsel %vm725_vm4, %v724_v40, %v718_v39 }
 0x546   : > { %v722_v42 = vpop.permute.xlu1 %721 }
 0x547   : > { %v728_v43 = vsel %vm727_vm5, %v726_v41, %v722_v42 }
 0x548   : > { %729 = vst.msk [vmem:[%s200_s20] sm:$0xff] %vm226_vm1, %v728_v43 }
 0x549   : > { %1089 = shalt.err (!%p1086_p7)
}
 0x54a   : > { %s1090_s30 = scalar_lea.hbm %s1413_s5, 128  ;;  %s1094_s29 = scalar_lea.hbm %s1461_s3, 256 }
 0x54b   : > { %p1091_p9 = scmp.ne.s32.totalorder %s1413_s5, %s1090_s30  ;;  %p1095_p0 = scmp.lt.u32.totalorder %s1413_s5, %s1461_s3 }
 0x54c   : > { %p1096_p1 = scmp.lt.u32.totalorder %s1094_s29, %s1090_s30  ;;  %p1098_p4 = scmp.lt.u32.totalorder %s1090_s30, %s1413_s5 }
 0x54d   : > { %p1092_p2 = pnand %p1091_p9, %p1280_p12 }
 0x54e   : > { %p1097_p11 = por %p1096_p1, %p1095_p0 }
 0x54f   : > { %p1093_p5 = pneg %p1092_p2 }
 0x550   : > { %p1099_p6 = por %p1098_p4, %p1097_p11 }
 0x552   : > { %p1100_p8 = pnand %p1099_p6, %p1093_p5 }
 0x554   : > { %1103 = shalt.err (!%p1100_p8)
}
 0x555   : > { %931 = dma.vmem_to_hbm [thread:$0]  (%p1280_p12), %s1415_s4, 128, %s1413_s5, %s731_s16  }
 0x556 PF: > { %s756_s6 = sand.u32 1, %s1134_s12   ;;  %p1476_p10 = scmp.ne.s32.totalorder %s1466_s19, 0 }
 0x557   : > { %p1477_p13 = scmp.ge.s32.totalorder %s1146_s15, 2  ;;  %s757_s7 = scalar_lea.sflag [#allocation4], %s756_s6 }
 0x559   : > { %p942_p3 = pnand %p1477_p13, %p1476_p10 }
 0x55b   : > { %1129 = dma.done.wait (!%p942_p3), %s757_s7, 128  }
 0x55c   : > { %1131 = vsyncadd (!%p942_p3), %s757_s7, 4294967168  ;;  %p17_p7 = scmp.ge.s32.totalorder %s1245_s24, 4   ;;  %s1478_s12 = smov %s1138_s13 }
 0x55d   : > { %s1479_s13 = smov %s1142_s14  ;;  %s1480_s14 = smov %s1276_s17 }
 0x55e   : > { %s1481_s15 = smov %s1245_s24  ;;  %19 = sbr.rel (!%p17_p7) target bundleno = 6 (0x6), region = 81 }
 0x565   :  { %762 = vsyncpa [#allocation3], 1 }
 0x566   :  { %764 = vsyncpa [#allocation3 + $0x1], 1 }
 0x567   :  { %765 = vsyncpa [#allocation6], 1 }
 0x568   :  { %766 = vsyncpa [#allocation4], 1 }
 0x569   :  { %768 = vsyncpa [#allocation4 + $0x1], 1 }

</bundles_post_ra>
